<compile_context>
chip_gen: v6e
topology: v6e:2x2x1
jax: 0.10.0
libtpu: 0.0.40
codegen_flags: <defaults>
</compile_context>

<pallas_src>
import functools

import jax
import jax.numpy as jnp
from jax import lax
from jax.experimental import pallas as pl
from jax.experimental.pallas import tpu as pltpu


def _round_up(x, m):
    return (x + m - 1) // m * m


def _f_conv_kernel(x_ref, w1_ref, b1_ref, w2_ref, b2_ref, w3_ref, b3_ref,
                   mask_ref, o_ref, *, K, Wp, NbL, leaky_slope, compute_dtype):
    """Fused conv1+lrelu -> conv2+lrelu -> conv3 for Nb packed images.

    x_ref:    (1, Cin_p, NbL)   channel-major slab; each image owns an
                                L-aligned, zero-padded lane segment.
    w*_ref:   (K, Cout*, K*Cin*) per-row im2col weights (compute dtype)
    b*_ref:   (Cout*, 1) f32
    mask_ref: (1, NbL) f32      1.0 on valid interior pixels, 0.0 on halo/tail
    o_ref:    (1, Cout_p, NbL)
    """
    pad = K // 2
    mask = mask_ref[...]                                    # (1, NbL) f32

    def conv_layer(h, w_ref, b_ref, activate):
        # h: (C, NbL) f32 with zero halo / zero tail.
        hc = h.astype(compute_dtype)                        # cast BEFORE taps
        y = None
        for kh in range(K):
            rs = (kh - pad) * Wp                            # row shift (flat)
            hrow = hc if rs == 0 else pltpu.roll(hc, (-rs) % NbL, axis=1)
            taps = []
            for kw in range(K):
                cs = kw - pad
                taps.append(hrow if cs == 0
                            else pltpu.roll(hrow, (-cs) % NbL, axis=1))
            patches = jnp.concatenate(taps, axis=0)         # (K*C, NbL)
            d = jnp.dot(w_ref[kh], patches,
                        preferred_element_type=jnp.float32)  # (Cout, NbL) f32
            y = d if y is None else y + d
        y = y + b_ref[...]
        if activate:
            y = jnp.where(y >= 0, y, jnp.float32(leaky_slope) * y)
            y = y * mask      # re-zero halo/tail -> padding for the next conv
        return y

    x = x_ref[0].astype(jnp.float32)                        # (Cin_p, NbL)
    h1 = conv_layer(x, w1_ref, b1_ref, activate=True)
    h2 = conv_layer(h1, w2_ref, b2_ref, activate=True)
    y3 = conv_layer(h2, w3_ref, b3_ref, activate=False)     # halo cropped outside
    o_ref[0] = y3.astype(o_ref.dtype)


def _prep_weight(w_hwio, cin_pad, cout_pad):
    """(K, K, Cin, Cout) HWIO -> (K, cout_pad, K*cin_pad).

    Column order of slice kh is kw*cin_pad + ci, matching the in-kernel
    per-row concat of kw taps.
    """
    K, _, Cin, Cout = w_hwio.shape
    w = jnp.pad(w_hwio, ((0, 0), (0, 0), (0, cin_pad - Cin), (0, cout_pad - Cout)))
    return jnp.transpose(w, (0, 3, 1, 2)).reshape(K, cout_pad, K * cin_pad)


def _vmem_limit_bytes(est_bytes):
    try:
        cap = pltpu.get_tpu_info().vmem_capacity_bytes
    except Exception:  # conservative fallback (v7x per-TC capacity)
        cap = 64 * 1024 * 1024
    hi = min(100 * 1024 * 1024, (cap * 3) // 4)      # leave headroom
    lo = 32 * 1024 * 1024                            # never below v6e/v7x default
    return int(min(max(int(est_bytes), lo), max(hi, lo)))


@functools.partial(jax.jit, static_argnames=("leaky_slope", "use_bf16"))
def f_conv_forward(x_nchw, params, leaky_slope=0.1, use_bf16=True):
    """Forward pass of F_conv (batch_norm=False, bias=True path). NCHW in/out."""
    # TODO(synk): batch_norm=True branch (BatchNorm2d running stats) not
    # implemented; the default constructor path (batch_norm=False) is reproduced.
    N, Cin, H, W = x_nchw.shape
    w1, w2, w3 = params["w1"], params["w2"], params["w3"]
    b1, b2, b3 = params["b1"], params["b2"], params["b3"]
    K = w1.shape[0]
    pad = K // 2
    Ch = w1.shape[3]
    Cout = w3.shape[3]
    Hp, Wp = H + 2 * pad, W + 2 * pad
    L = _round_up(Hp * Wp, 128)            # lane-aligned flattened padded image
    Cin_p = _round_up(Cin, 8)              # sublane-aligned channel counts
    Ch_p = _round_up(Ch, 8)
    Cout_p = _round_up(Cout, 8)            # full-tile unmasked output stores

    # ---- batch blocking: Nb images per grid step, grid >= 2 when N >= 2 ----
    Nb = max(1, min(8, (N + 1) // 2))
    G = -(-N // Nb)
    N_pad = G * Nb
    NbL = Nb * L

    cdt = jnp.bfloat16 if use_bf16 else jnp.float32
    c_bytes = 2 if use_bf16 else 4

    # ---- one-time layout prep (tiny XLA ops on KB-scale tensors) ----
    # NCHW -> zero-padded channel-major slab (G, Cin_p, Nb*L)
    xp = jnp.pad(x_nchw, ((0, N_pad - N), (0, Cin_p - Cin),
                          (pad, pad), (pad, pad)))
    x_slab = jnp.pad(xp.reshape(N_pad, Cin_p, Hp * Wp),
                     ((0, 0), (0, 0), (0, L - Hp * Wp)))
    x_slab = (x_slab.reshape(G, Nb, Cin_p, L)
              .transpose(0, 2, 1, 3).reshape(G, Cin_p, NbL))

    w1k = _prep_weight(w1, Cin_p, Ch_p).astype(cdt)
    w2k = _prep_weight(w2, Ch_p, Ch_p).astype(cdt)
    w3k = _prep_weight(w3, Ch_p, Cout_p).astype(cdt)
    b1k = jnp.pad(b1, (0, Ch_p - Ch)).reshape(Ch_p, 1).astype(jnp.float32)
    b2k = jnp.pad(b2, (0, Ch_p - Ch)).reshape(Ch_p, 1).astype(jnp.float32)
    b3k = jnp.pad(b3, (0, Cout_p - Cout)).reshape(Cout_p, 1).astype(jnp.float32)

    # valid-pixel mask over the flattened padded grid, tiled across Nb images
    ii = jnp.arange(Hp)
    jj = jnp.arange(Wp)
    valid = (((ii >= pad) & (ii < pad + H))[:, None]
             & ((jj >= pad) & (jj < pad + W))[None, :]).astype(jnp.float32)
    mask1 = jnp.pad(valid.reshape(1, Hp * Wp), ((0, 0), (0, L - Hp * Wp)))
    mask = jnp.tile(mask1, (1, Nb))                           # (1, NbL)

    kernel = functools.partial(_f_conv_kernel, K=K, Wp=Wp, NbL=NbL,
                               leaky_slope=leaky_slope, compute_dtype=cdt)

    flops = 2 * N_pad * L * K * K * (Cin_p * Ch_p + Ch_p * Ch_p + Ch_p * Cout_p)
    bytes_accessed = (x_slab.size * 4 + G * Cout_p * NbL * 4
                      + (w1k.size + w2k.size + w3k.size) * c_bytes
                      + (b1k.size + b2k.size + b3k.size + mask.size) * 4)

    est_vmem = (2 * 4 * Cin_p * NbL                  # double-buffered x block
                + 2 * 4 * Cout_p * NbL               # double-buffered out block
                + 4 * NbL * (2 * Ch_p + Cout_p + 1)  # f32 h1/h2/acc/mask residents
                + c_bytes * NbL * (K + 2) * max(Cin_p, Ch_p)  # taps + patch slab
                + 2 * c_bytes * (w1k.size + w2k.size + w3k.size)
                + (1 << 22))                          # headroom for spills

    out_slab = pl.pallas_call(
        kernel,
        out_shape=jax.ShapeDtypeStruct((G, Cout_p, NbL), x_nchw.dtype),
        grid_spec=pltpu.PrefetchScalarGridSpec(
            num_scalar_prefetch=0,
            grid=(G,),
            in_specs=[
                pl.BlockSpec((1, Cin_p, NbL), lambda g: (g, 0, 0)),
                pl.BlockSpec(w1k.shape, lambda g: (0, 0, 0)),
                pl.BlockSpec(b1k.shape, lambda g: (0, 0)),
                pl.BlockSpec(w2k.shape, lambda g: (0, 0, 0)),
                pl.BlockSpec(b2k.shape, lambda g: (0, 0)),
                pl.BlockSpec(w3k.shape, lambda g: (0, 0, 0)),
                pl.BlockSpec(b3k.shape, lambda g: (0, 0)),
                pl.BlockSpec(mask.shape, lambda g: (0, 0)),
            ],
            out_specs=pl.BlockSpec((1, Cout_p, NbL), lambda g: (g, 0, 0)),
        ),
        compiler_params=pltpu.CompilerParams(
            dimension_semantics=("parallel",),     # batch blocks across TCs on v7x
            vmem_limit_bytes=_vmem_limit_bytes(est_vmem)),
        cost_estimate=pl.CostEstimate(
            flops=flops, transcendentals=0, bytes_accessed=bytes_accessed),
    )(x_slab, w1k, b1k, w2k, b2k, w3k, b3k, mask)

    # unpack batch blocks, crop halo / alignment tail / channel pad -> NCHW
    out = (out_slab.reshape(G, Cout_p, Nb, L)
           .transpose(0, 2, 1, 3).reshape(N_pad, Cout_p, L))
    out = out[:N, :Cout, :Hp * Wp].reshape(N, Cout, Hp, Wp)
    return out[:, :, pad:pad + H, pad:pad + W]


def init_f_conv_params(key, in_channels, channels, channels_hidden=None,
                       kernel_size=3):
    """Deterministic init mirroring nn.Conv2d default (uniform +/- 1/sqrt(fan_in)).
    Weights stored HWIO: (K, K, Cin, Cout); biases (Cout,)."""
    if not channels_hidden:
        channels_hidden = channels
    dims = [(in_channels, channels_hidden),
            (channels_hidden, channels_hidden),
            (channels_hidden, channels)]
    keys = jax.random.split(key, 2 * len(dims))
    params = {}
    for i, (cin, cout) in enumerate(dims):
        fan_in = cin * kernel_size * kernel_size
        bound = 1.0 / (fan_in ** 0.5)
        params[f"w{i+1}"] = jax.random.uniform(
            keys[2 * i], (kernel_size, kernel_size, cin, cout),
            jnp.float32, -bound, bound)
        params[f"b{i+1}"] = jax.random.uniform(
            keys[2 * i + 1], (cout,), jnp.float32, -bound, bound)
    return params


def _reference_forward(x_nchw, params, leaky_slope=0.1):
    """Pure-JAX reference (lax conv) used only for the correctness check."""
    def conv(x, w, b):  # x NHWC, w (K,K,Cin,Cout)
        y = lax.conv_general_dilated(
            x, w, window_strides=(1, 1), padding="SAME",
            dimension_numbers=("NHWC", "HWIO", "NHWC"),
            precision=lax.Precision.HIGHEST)
        return y + b[None, None, None, :]

    x = jnp.transpose(x_nchw, (0, 2, 3, 1))
    x = conv(x, params["w1"], params["b1"])
    x = jnp.where(x >= 0, x, leaky_slope * x)
    x = conv(x, params["w2"], params["b2"])
    x = jnp.where(x >= 0, x, leaky_slope * x)
    x = conv(x, params["w3"], params["b3"])
    return jnp.transpose(x, (0, 3, 1, 2))


if __name__ == "__main__":
    key = jax.random.PRNGKey(0)
    k_x1, k_x2, k_p = jax.random.split(key, 3)

    # Small shapes consistent with the module: batch=2, in_channels=4,
    # spatial=16x16, channels(out)=4, channels_hidden=8.
    in_channels, channels, channels_hidden = 4, 4, 8
    params = init_f_conv_params(k_p, in_channels, channels, channels_hidden)

    x1 = jax.random.normal(k_x1, (2, in_channels, 16, 16), jnp.float32)
    ref1 = _reference_forward(x1, params)

    # Exact f32 path (tight tolerance vs HIGHEST-precision reference).
    out_f32 = jax.block_until_ready(f_conv_forward(x1, params, use_bf16=False))
    assert out_f32.shape == (2, channels, 16, 16)
    err = float(jnp.max(jnp.abs(out_f32 - ref1)))
    assert jnp.allclose(out_f32, ref1, atol=5e-3, rtol=5e-3), (
        f"f32 path mismatch vs reference, max abs err = {err}")

    # Fast bf16 tap/weight path (looser tolerance, per perf review).
    out_bf16 = jax.block_until_ready(f_conv_forward(x1, params, use_bf16=True))
    err = float(jnp.max(jnp.abs(out_bf16 - ref1)))
    assert jnp.allclose(out_bf16, ref1, atol=5e-2, rtol=5e-2), (
        f"bf16 path mismatch vs reference, max abs err = {err}")

    # Odd batch + different spatial size: exercises Nb>1 packing, the padded
    # batch tail, and a different L alignment (14*14 -> L=256).
    x2 = jax.random.normal(k_x2, (5, in_channels, 12, 12), jnp.float32)
    ref2 = _reference_forward(x2, params)
    out2 = jax.block_until_ready(f_conv_forward(x2, params, use_bf16=True))
    assert out2.shape == (5, channels, 12, 12)
    err = float(jnp.max(jnp.abs(out2 - ref2)))
    assert jnp.allclose(out2, ref2, atol=5e-2, rtol=5e-2), (
        f"bf16 batched path mismatch vs reference, max abs err = {err}")

    print("KERNEL_OK")
</pallas_src>

<mosaic_0001>
module attributes {stable_mosaic.version = 11 : i64} {
  func.func @_f_conv_kernel(%arg0: i32, %arg1: memref<1x8x384xf32, #tpu.memory_space<vmem>>, %arg2: memref<3x8x24xf32, #tpu.memory_space<vmem>>, %arg3: memref<8x1xf32, #tpu.memory_space<vmem>>, %arg4: memref<3x8x24xf32, #tpu.memory_space<vmem>>, %arg5: memref<8x1xf32, #tpu.memory_space<vmem>>, %arg6: memref<3x8x24xf32, #tpu.memory_space<vmem>>, %arg7: memref<8x1xf32, #tpu.memory_space<vmem>>, %arg8: memref<1x384xf32, #tpu.memory_space<vmem>>, %arg9: memref<1x8x384xf32, #tpu.memory_space<vmem>>) attributes {dimension_semantics = [#tpu.dimension_semantics<parallel>], iteration_bounds = array<i64: 2>, scalar_prefetch = 0 : i64, scratch_operands = 0 : i64, tpu.core_type = #tpu.core_type<tc>, window_params = [{transform_indices = @transform_0, window_bounds = array<i64: 1, 8, 384>}, {pipeline_mode = #tpu.pipeline_mode<synchronous>, transform_indices = @transform_1, window_bounds = array<i64: 3, 8, 24>}, {pipeline_mode = #tpu.pipeline_mode<synchronous>, transform_indices = @transform_2, window_bounds = array<i64: 8, 1>}, {pipeline_mode = #tpu.pipeline_mode<synchronous>, transform_indices = @transform_3, window_bounds = array<i64: 3, 8, 24>}, {pipeline_mode = #tpu.pipeline_mode<synchronous>, transform_indices = @transform_4, window_bounds = array<i64: 8, 1>}, {pipeline_mode = #tpu.pipeline_mode<synchronous>, transform_indices = @transform_5, window_bounds = array<i64: 3, 8, 24>}, {pipeline_mode = #tpu.pipeline_mode<synchronous>, transform_indices = @transform_6, window_bounds = array<i64: 8, 1>}, {pipeline_mode = #tpu.pipeline_mode<synchronous>, transform_indices = @transform_7, window_bounds = array<i64: 1, 384>}, {transform_indices = @transform_8, window_bounds = array<i64: 1, 8, 384>}]} {
    %c0 = arith.constant 0 : index
    %c0_0 = arith.constant 0 : index
    %0 = vector.load %arg8[%c0, %c0_0] : memref<1x384xf32, #tpu.memory_space<vmem>>, vector<1x384xf32>
    %c0_1 = arith.constant 0 : index
    %c0_2 = arith.constant 0 : index
    %c0_3 = arith.constant 0 : index
    %1 = vector.load %arg1[%c0_1, %c0_2, %c0_3] : memref<1x8x384xf32, #tpu.memory_space<vmem>>, vector<1x8x384xf32>
    %2 = vector.shape_cast %1 : vector<1x8x384xf32> to vector<8x384xf32>
    %c18_i32 = arith.constant 18 : i32
    %3 = tpu.dynamic_rotate %2 by %c18_i32 dim 1 : vector<8x384xf32>, i32 -> vector<8x384xf32>
    %c1_i32 = arith.constant 1 : i32
    %4 = tpu.dynamic_rotate %3 by %c1_i32 dim 1 : vector<8x384xf32>, i32 -> vector<8x384xf32>
    %c383_i32 = arith.constant 383 : i32
    %5 = tpu.dynamic_rotate %3 by %c383_i32 dim 1 : vector<8x384xf32>, i32 -> vector<8x384xf32>
    %6 = tpu.concatenate %4, %3, %5 in 0 : vector<8x384xf32>, vector<8x384xf32>, vector<8x384xf32> -> vector<24x384xf32>
    %c0_4 = arith.constant 0 : index
    %c0_5 = arith.constant 0 : index
    %c0_6 = arith.constant 0 : index
    %7 = vector.load %arg2[%c0_4, %c0_5, %c0_6] : memref<3x8x24xf32, #tpu.memory_space<vmem>>, vector<1x8x24xf32>
    %8 = vector.shape_cast %7 : vector<1x8x24xf32> to vector<8x24xf32>
    %cst = arith.constant dense<0.000000e+00> : vector<8x384xf32>
    %9 = tpu.matmul %8, %6, %cst {dimension_numbers = #tpu.dot_dimension_numbers<[1], [0], [0], [1], [0, 0, 1, 1], [], []>} : vector<8x24xf32>, vector<24x384xf32>, vector<8x384xf32> -> vector<8x384xf32>
    %c1_i32_7 = arith.constant 1 : i32
    %10 = tpu.dynamic_rotate %2 by %c1_i32_7 dim 1 : vector<8x384xf32>, i32 -> vector<8x384xf32>
    %c383_i32_8 = arith.constant 383 : i32
    %11 = tpu.dynamic_rotate %2 by %c383_i32_8 dim 1 : vector<8x384xf32>, i32 -> vector<8x384xf32>
    %12 = tpu.concatenate %10, %2, %11 in 0 : vector<8x384xf32>, vector<8x384xf32>, vector<8x384xf32> -> vector<24x384xf32>
    %c1 = arith.constant 1 : index
    %c0_9 = arith.constant 0 : index
    %c0_10 = arith.constant 0 : index
    %13 = vector.load %arg2[%c1, %c0_9, %c0_10] : memref<3x8x24xf32, #tpu.memory_space<vmem>>, vector<1x8x24xf32>
    %14 = vector.shape_cast %13 : vector<1x8x24xf32> to vector<8x24xf32>
    %cst_11 = arith.constant dense<0.000000e+00> : vector<8x384xf32>
    %15 = tpu.matmul %14, %12, %cst_11 {dimension_numbers = #tpu.dot_dimension_numbers<[1], [0], [0], [1], [0, 0, 1, 1], [], []>} : vector<8x24xf32>, vector<24x384xf32>, vector<8x384xf32> -> vector<8x384xf32>
    %16 = arith.addf %9, %15 : vector<8x384xf32>
    %c366_i32 = arith.constant 366 : i32
    %17 = tpu.dynamic_rotate %2 by %c366_i32 dim 1 : vector<8x384xf32>, i32 -> vector<8x384xf32>
    %c1_i32_12 = arith.constant 1 : i32
    %18 = tpu.dynamic_rotate %17 by %c1_i32_12 dim 1 : vector<8x384xf32>, i32 -> vector<8x384xf32>
    %c383_i32_13 = arith.constant 383 : i32
    %19 = tpu.dynamic_rotate %17 by %c383_i32_13 dim 1 : vector<8x384xf32>, i32 -> vector<8x384xf32>
    %20 = tpu.concatenate %18, %17, %19 in 0 : vector<8x384xf32>, vector<8x384xf32>, vector<8x384xf32> -> vector<24x384xf32>
    %c2 = arith.constant 2 : index
    %c0_14 = arith.constant 0 : index
    %c0_15 = arith.constant 0 : index
    %21 = vector.load %arg2[%c2, %c0_14, %c0_15] : memref<3x8x24xf32, #tpu.memory_space<vmem>>, vector<1x8x24xf32>
    %22 = vector.shape_cast %21 : vector<1x8x24xf32> to vector<8x24xf32>
    %cst_16 = arith.constant dense<0.000000e+00> : vector<8x384xf32>
    %23 = tpu.matmul %22, %20, %cst_16 {dimension_numbers = #tpu.dot_dimension_numbers<[1], [0], [0], [1], [0, 0, 1, 1], [], []>} : vector<8x24xf32>, vector<24x384xf32>, vector<8x384xf32> -> vector<8x384xf32>
    %24 = arith.addf %16, %23 : vector<8x384xf32>
    %c0_17 = arith.constant 0 : index
    %c0_18 = arith.constant 0 : index
    %25 = vector.load %arg3[%c0_17, %c0_18] : memref<8x1xf32, #tpu.memory_space<vmem>>, vector<8x1xf32>
    %26 = vector.broadcast %25 : vector<8x1xf32> to vector<8x384xf32>
    %27 = arith.addf %24, %26 : vector<8x384xf32>
    %cst_19 = arith.constant 0.000000e+00 : f32
    %28 = vector.broadcast %cst_19 : f32 to vector<8x384xf32>
    %29 = arith.cmpf oge, %27, %28 : vector<8x384xf32>
    %cst_20 = arith.constant 1.000000e-01 : f32
    %30 = vector.broadcast %cst_20 : f32 to vector<8x384xf32>
    %31 = arith.mulf %30, %27 : vector<8x384xf32>
    %32 = arith.select %29, %27, %31 : vector<8x384xi1>, vector<8x384xf32>
    %33 = vector.broadcast %0 : vector<1x384xf32> to vector<8x384xf32>
    %34 = arith.mulf %32, %33 : vector<8x384xf32>
    %c18_i32_21 = arith.constant 18 : i32
    %35 = tpu.dynamic_rotate %34 by %c18_i32_21 dim 1 : vector<8x384xf32>, i32 -> vector<8x384xf32>
    %c1_i32_22 = arith.constant 1 : i32
    %36 = tpu.dynamic_rotate %35 by %c1_i32_22 dim 1 : vector<8x384xf32>, i32 -> vector<8x384xf32>
    %c383_i32_23 = arith.constant 383 : i32
    %37 = tpu.dynamic_rotate %35 by %c383_i32_23 dim 1 : vector<8x384xf32>, i32 -> vector<8x384xf32>
    %38 = tpu.concatenate %36, %35, %37 in 0 : vector<8x384xf32>, vector<8x384xf32>, vector<8x384xf32> -> vector<24x384xf32>
    %c0_24 = arith.constant 0 : index
    %c0_25 = arith.constant 0 : index
    %c0_26 = arith.constant 0 : index
    %39 = vector.load %arg4[%c0_24, %c0_25, %c0_26] : memref<3x8x24xf32, #tpu.memory_space<vmem>>, vector<1x8x24xf32>
    %40 = vector.shape_cast %39 : vector<1x8x24xf32> to vector<8x24xf32>
    %cst_27 = arith.constant dense<0.000000e+00> : vector<8x384xf32>
    %41 = tpu.matmul %40, %38, %cst_27 {dimension_numbers = #tpu.dot_dimension_numbers<[1], [0], [0], [1], [0, 0, 1, 1], [], []>} : vector<8x24xf32>, vector<24x384xf32>, vector<8x384xf32> -> vector<8x384xf32>
    %c1_i32_28 = arith.constant 1 : i32
    %42 = tpu.dynamic_rotate %34 by %c1_i32_28 dim 1 : vector<8x384xf32>, i32 -> vector<8x384xf32>
    %c383_i32_29 = arith.constant 383 : i32
    %43 = tpu.dynamic_rotate %34 by %c383_i32_29 dim 1 : vector<8x384xf32>, i32 -> vector<8x384xf32>
    %44 = tpu.concatenate %42, %34, %43 in 0 : vector<8x384xf32>, vector<8x384xf32>, vector<8x384xf32> -> vector<24x384xf32>
    %c1_30 = arith.constant 1 : index
    %c0_31 = arith.constant 0 : index
    %c0_32 = arith.constant 0 : index
    %45 = vector.load %arg4[%c1_30, %c0_31, %c0_32] : memref<3x8x24xf32, #tpu.memory_space<vmem>>, vector<1x8x24xf32>
    %46 = vector.shape_cast %45 : vector<1x8x24xf32> to vector<8x24xf32>
    %cst_33 = arith.constant dense<0.000000e+00> : vector<8x384xf32>
    %47 = tpu.matmul %46, %44, %cst_33 {dimension_numbers = #tpu.dot_dimension_numbers<[1], [0], [0], [1], [0, 0, 1, 1], [], []>} : vector<8x24xf32>, vector<24x384xf32>, vector<8x384xf32> -> vector<8x384xf32>
    %48 = arith.addf %41, %47 : vector<8x384xf32>
    %c366_i32_34 = arith.constant 366 : i32
    %49 = tpu.dynamic_rotate %34 by %c366_i32_34 dim 1 : vector<8x384xf32>, i32 -> vector<8x384xf32>
    %c1_i32_35 = arith.constant 1 : i32
    %50 = tpu.dynamic_rotate %49 by %c1_i32_35 dim 1 : vector<8x384xf32>, i32 -> vector<8x384xf32>
    %c383_i32_36 = arith.constant 383 : i32
    %51 = tpu.dynamic_rotate %49 by %c383_i32_36 dim 1 : vector<8x384xf32>, i32 -> vector<8x384xf32>
    %52 = tpu.concatenate %50, %49, %51 in 0 : vector<8x384xf32>, vector<8x384xf32>, vector<8x384xf32> -> vector<24x384xf32>
    %c2_37 = arith.constant 2 : index
    %c0_38 = arith.constant 0 : index
    %c0_39 = arith.constant 0 : index
    %53 = vector.load %arg4[%c2_37, %c0_38, %c0_39] : memref<3x8x24xf32, #tpu.memory_space<vmem>>, vector<1x8x24xf32>
    %54 = vector.shape_cast %53 : vector<1x8x24xf32> to vector<8x24xf32>
    %cst_40 = arith.constant dense<0.000000e+00> : vector<8x384xf32>
    %55 = tpu.matmul %54, %52, %cst_40 {dimension_numbers = #tpu.dot_dimension_numbers<[1], [0], [0], [1], [0, 0, 1, 1], [], []>} : vector<8x24xf32>, vector<24x384xf32>, vector<8x384xf32> -> vector<8x384xf32>
    %56 = arith.addf %48, %55 : vector<8x384xf32>
    %c0_41 = arith.constant 0 : index
    %c0_42 = arith.constant 0 : index
    %57 = vector.load %arg5[%c0_41, %c0_42] : memref<8x1xf32, #tpu.memory_space<vmem>>, vector<8x1xf32>
    %58 = vector.broadcast %57 : vector<8x1xf32> to vector<8x384xf32>
    %59 = arith.addf %56, %58 : vector<8x384xf32>
    %cst_43 = arith.constant 0.000000e+00 : f32
    %60 = vector.broadcast %cst_43 : f32 to vector<8x384xf32>
    %61 = arith.cmpf oge, %59, %60 : vector<8x384xf32>
    %cst_44 = arith.constant 1.000000e-01 : f32
    %62 = vector.broadcast %cst_44 : f32 to vector<8x384xf32>
    %63 = arith.mulf %62, %59 : vector<8x384xf32>
    %64 = arith.select %61, %59, %63 : vector<8x384xi1>, vector<8x384xf32>
    %65 = vector.broadcast %0 : vector<1x384xf32> to vector<8x384xf32>
    %66 = arith.mulf %64, %65 : vector<8x384xf32>
    %c18_i32_45 = arith.constant 18 : i32
    %67 = tpu.dynamic_rotate %66 by %c18_i32_45 dim 1 : vector<8x384xf32>, i32 -> vector<8x384xf32>
    %c1_i32_46 = arith.constant 1 : i32
    %68 = tpu.dynamic_rotate %67 by %c1_i32_46 dim 1 : vector<8x384xf32>, i32 -> vector<8x384xf32>
    %c383_i32_47 = arith.constant 383 : i32
    %69 = tpu.dynamic_rotate %67 by %c383_i32_47 dim 1 : vector<8x384xf32>, i32 -> vector<8x384xf32>
    %70 = tpu.concatenate %68, %67, %69 in 0 : vector<8x384xf32>, vector<8x384xf32>, vector<8x384xf32> -> vector<24x384xf32>
    %c0_48 = arith.constant 0 : index
    %c0_49 = arith.constant 0 : index
    %c0_50 = arith.constant 0 : index
    %71 = vector.load %arg6[%c0_48, %c0_49, %c0_50] : memref<3x8x24xf32, #tpu.memory_space<vmem>>, vector<1x8x24xf32>
    %72 = vector.shape_cast %71 : vector<1x8x24xf32> to vector<8x24xf32>
    %cst_51 = arith.constant dense<0.000000e+00> : vector<8x384xf32>
    %73 = tpu.matmul %72, %70, %cst_51 {dimension_numbers = #tpu.dot_dimension_numbers<[1], [0], [0], [1], [0, 0, 1, 1], [], []>} : vector<8x24xf32>, vector<24x384xf32>, vector<8x384xf32> -> vector<8x384xf32>
    %c1_i32_52 = arith.constant 1 : i32
    %74 = tpu.dynamic_rotate %66 by %c1_i32_52 dim 1 : vector<8x384xf32>, i32 -> vector<8x384xf32>
    %c383_i32_53 = arith.constant 383 : i32
    %75 = tpu.dynamic_rotate %66 by %c383_i32_53 dim 1 : vector<8x384xf32>, i32 -> vector<8x384xf32>
    %76 = tpu.concatenate %74, %66, %75 in 0 : vector<8x384xf32>, vector<8x384xf32>, vector<8x384xf32> -> vector<24x384xf32>
    %c1_54 = arith.constant 1 : index
    %c0_55 = arith.constant 0 : index
    %c0_56 = arith.constant 0 : index
    %77 = vector.load %arg6[%c1_54, %c0_55, %c0_56] : memref<3x8x24xf32, #tpu.memory_space<vmem>>, vector<1x8x24xf32>
    %78 = vector.shape_cast %77 : vector<1x8x24xf32> to vector<8x24xf32>
    %cst_57 = arith.constant dense<0.000000e+00> : vector<8x384xf32>
    %79 = tpu.matmul %78, %76, %cst_57 {dimension_numbers = #tpu.dot_dimension_numbers<[1], [0], [0], [1], [0, 0, 1, 1], [], []>} : vector<8x24xf32>, vector<24x384xf32>, vector<8x384xf32> -> vector<8x384xf32>
    %80 = arith.addf %73, %79 : vector<8x384xf32>
    %c366_i32_58 = arith.constant 366 : i32
    %81 = tpu.dynamic_rotate %66 by %c366_i32_58 dim 1 : vector<8x384xf32>, i32 -> vector<8x384xf32>
    %c1_i32_59 = arith.constant 1 : i32
    %82 = tpu.dynamic_rotate %81 by %c1_i32_59 dim 1 : vector<8x384xf32>, i32 -> vector<8x384xf32>
    %c383_i32_60 = arith.constant 383 : i32
    %83 = tpu.dynamic_rotate %81 by %c383_i32_60 dim 1 : vector<8x384xf32>, i32 -> vector<8x384xf32>
    %84 = tpu.concatenate %82, %81, %83 in 0 : vector<8x384xf32>, vector<8x384xf32>, vector<8x384xf32> -> vector<24x384xf32>
    %c2_61 = arith.constant 2 : index
    %c0_62 = arith.constant 0 : index
    %c0_63 = arith.constant 0 : index
    %85 = vector.load %arg6[%c2_61, %c0_62, %c0_63] : memref<3x8x24xf32, #tpu.memory_space<vmem>>, vector<1x8x24xf32>
    %86 = vector.shape_cast %85 : vector<1x8x24xf32> to vector<8x24xf32>
    %cst_64 = arith.constant dense<0.000000e+00> : vector<8x384xf32>
    %87 = tpu.matmul %86, %84, %cst_64 {dimension_numbers = #tpu.dot_dimension_numbers<[1], [0], [0], [1], [0, 0, 1, 1], [], []>} : vector<8x24xf32>, vector<24x384xf32>, vector<8x384xf32> -> vector<8x384xf32>
    %88 = arith.addf %80, %87 : vector<8x384xf32>
    %c0_65 = arith.constant 0 : index
    %c0_66 = arith.constant 0 : index
    %89 = vector.load %arg7[%c0_65, %c0_66] : memref<8x1xf32, #tpu.memory_space<vmem>>, vector<8x1xf32>
    %90 = vector.broadcast %89 : vector<8x1xf32> to vector<8x384xf32>
    %91 = arith.addf %88, %90 : vector<8x384xf32>
    %c0_67 = arith.constant 0 : index
    %c0_68 = arith.constant 0 : index
    %c0_69 = arith.constant 0 : index
    %92 = vector.load %arg9[%c0_67, %c0_68, %c0_69] : memref<1x8x384xf32, #tpu.memory_space<vmem>>, vector<1x8x384xf32>
    %93 = vector.shape_cast %92 : vector<1x8x384xf32> to vector<8x384xf32>
    %94 = vector.shape_cast %91 : vector<8x384xf32> to vector<1x8x384xf32>
    tpu.vector_store %arg9[%c0_67, %c0_68, %c0_69], %94 {strides = array<i32>} : memref<1x8x384xf32, #tpu.memory_space<vmem>>, vector<1x8x384xf32>,
    return
  }
  func.func @transform_0(%arg0: i32) -> (i32, i32, i32) {
    %c0_i32 = arith.constant 0 : i32
    %c0_i32_0 = arith.constant 0 : i32
    %c0_i32_1 = arith.constant 0 : i32
    return %arg0, %c0_i32, %c0_i32_0 : i32, i32, i32
  }
  func.func @transform_1(%arg0: i32) -> (i32, i32, i32) {
    %c0_i32 = arith.constant 0 : i32
    %c0_i32_0 = arith.constant 0 : i32
    %c0_i32_1 = arith.constant 0 : i32
    %c0_i32_2 = arith.constant 0 : i32
    return %c0_i32, %c0_i32_0, %c0_i32_1 : i32, i32, i32
  }
  func.func @transform_2(%arg0: i32) -> (i32, i32) {
    %c0_i32 = arith.constant 0 : i32
    %c0_i32_0 = arith.constant 0 : i32
    %c0_i32_1 = arith.constant 0 : i32
    return %c0_i32, %c0_i32_0 : i32, i32
  }
  func.func @transform_3(%arg0: i32) -> (i32, i32, i32) {
    %c0_i32 = arith.constant 0 : i32
    %c0_i32_0 = arith.constant 0 : i32
    %c0_i32_1 = arith.constant 0 : i32
    %c0_i32_2 = arith.constant 0 : i32
    return %c0_i32, %c0_i32_0, %c0_i32_1 : i32, i32, i32
  }
  func.func @transform_4(%arg0: i32) -> (i32, i32) {
    %c0_i32 = arith.constant 0 : i32
    %c0_i32_0 = arith.constant 0 : i32
    %c0_i32_1 = arith.constant 0 : i32
    return %c0_i32, %c0_i32_0 : i32, i32
  }
  func.func @transform_5(%arg0: i32) -> (i32, i32, i32) {
    %c0_i32 = arith.constant 0 : i32
    %c0_i32_0 = arith.constant 0 : i32
    %c0_i32_1 = arith.constant 0 : i32
    %c0_i32_2 = arith.constant 0 : i32
    return %c0_i32, %c0_i32_0, %c0_i32_1 : i32, i32, i32
  }
  func.func @transform_6(%arg0: i32) -> (i32, i32) {
    %c0_i32 = arith.constant 0 : i32
    %c0_i32_0 = arith.constant 0 : i32
    %c0_i32_1 = arith.constant 0 : i32
    return %c0_i32, %c0_i32_0 : i32, i32
  }
  func.func @transform_7(%arg0: i32) -> (i32, i32) {
    %c0_i32 = arith.constant 0 : i32
    %c0_i32_0 = arith.constant 0 : i32
    %c0_i32_1 = arith.constant 0 : i32
    return %c0_i32, %c0_i32_0 : i32, i32
  }
  func.func @transform_8(%arg0: i32) -> (i32, i32, i32) {
    %c0_i32 = arith.constant 0 : i32
    %c0_i32_0 = arith.constant 0 : i32
    %c0_i32_1 = arith.constant 0 : i32
    return %arg0, %c0_i32, %c0_i32_0 : i32, i32, i32
  }
}

</mosaic_0001>

<bundles_post_ra>
// kernel: f_conv_forward.1
= control target key start
LH: loop header
LB: loop body
LE: loop exit
PB: predicated region body
PF: predicated region fallthrough
CT: control target
= control target key end

     0   :  { %s2206_s27 = smov 0   ;;  %s2661_s0 = inlined_call_operand.vmem [shape: f32[2,8,384], index: 0, kind: input, shape index: {}]   ;;  %s2662_s1 = inlined_call_operand.vmem [shape: f32[3,8,24], index: 1, kind: input, shape index: {}]   ;;  %s2663_s2 = inlined_call_operand.vmem [shape: f32[8,1], index: 2, kind: input, shape index: {}]   ;;  %s2664_s3 = inlined_call_operand.vmem [shape: f32[3,8,24], index: 3, kind: input, shape index: {}]   ;;  %s2665_s4 = inlined_call_operand.vmem [shape: f32[8,1], index: 4, kind: input, shape index: {}]   ;;  %s2666_s5 = inlined_call_operand.vmem [shape: f32[3,8,24], index: 5, kind: input, shape index: {}]   ;;  %s2667_s6 = inlined_call_operand.vmem [shape: f32[8,1], index: 6, kind: input, shape index: {}]   ;;  %s2668_s7 = inlined_call_operand.vmem [shape: f32[1,384], index: 7, kind: input, shape index: {}]   ;;  %s2669_s8 = inlined_call_operand.vmem [shape: f32[2,8,384], index: 8, kind: output, shape index: {}]  }
   0x1 LB: > { %s1978_s28 = sadd.s32 4294967295, %s2152_s27   ;;  %p1982_p0 = scmp.ge.s32.totalorder %s2152_s27, 1  ;;  %s2152_s27 = sphi %s2206_s27, %s18_s27  }
   0x2   : > { %p262_p1 = scmp.lt.s32.totalorder %s2152_s27, 3 }
   0x4   : > { %p263_p2 = pnand %p1982_p0, %p262_p1 }
   0x5   : > { %p296_p3 = scmp.lt.s32.totalorder (!%p263_p2), %s1978_s28, 1  ;;  %s2154_s11 = smov (!%p263_p2), 18  }
   0x6   : > { %266 = sbr.rel (%p263_p2) target bundleno = 1398 (0x576), region = 52  ;;  %s2155_s12 = smov (!%p263_p2), 110  }
   0x7   : > { %s2156_s13 = smov (!%p263_p2), 127   ;;  %s2158_s14 = smov (!%p263_p2), 1  }
   0xb   : > { %s2671_s28 = smov (!%p296_p3, %s1978_s28), 1  ;;  %v2157_v3 = vmov 0.0   ;;  %v316_v4 = vlaneseq  ;;  %vm2159_vm0 = vmmov 0   ;;  %v2160_v24 = vmov 0   ;;  %v1985_v31 = vld [vmem:[%s2662_s1 + $0x8] sm:$0xff]  ;;  %v829_v32 = vld [vmem:[%s2663_s2] sm:$0xff] }
   0xc   : > { %s2128_s29 = smul.u32 24, %s2671_s28  ;;  %2047 = vmatprep.subr.mxu1 %v2157_v3  ;;  %431 = vmatprep.mubr.f32.mxu0 %v2157_v3  ;;  %vm363_vm5 = vcmask 195584   ;;  %v342_v45 = vld [vmem:[%s2662_s1] sm:$0xff]  ;;  %v1990_v55 = vld [vmem:[%s2662_s1 + $0x10] sm:$0xff] }
   0xd   : > { %2053 = vmatprep.mubr.msk.f32.mxu1 %vm2159_vm0, %v2157_v3  ;;  %v2251_v7 = vand.u32 127, %v316_v4  ;;  %2144 = vset.pattern.permute.xlu0 %v2160_v24 }
   0xe   : > { %s300_s10 = scalar_lea.vmem %s2661_s0, %s2128_s29  ;;  %2145 = vset.pattern.permute.xlu1 %v2160_v24  ;;  %s305_s24 = scalar_lea.vmem %s2669_s8, %s2128_s29 }
   0xf   : > { %v2222_v0 = vld [vmem:[%s300_s10 + $0x10] sm:$0xff]  ;;  %v2224_v1 = vld [vmem:[%s300_s10] sm:$0xff]  ;;  %v308_v2 = vld [vmem:[%s300_s10 + $0x8] sm:$0xff]  ;;  %vm318_vm1 = vcmp.lt.s32.totalorder %v2251_v7, 18  ;;  %vm338_vm2 = vcmp.lt.s32.totalorder %v2251_v7, 127  ;;  %vm658_vm3 = vcmp.lt.s32.totalorder %v2251_v7, 110 }
  0x10   : > { %314 = vrot.lane.b32.xlu1 %v2222_v0, %s2154_s11  ;;  %310 = vrot.lane.b32.xlu0 %v2224_v1, %s2154_s11  ;;  %vm328_vm4 = vcmp.lt.s32.totalorder %v2251_v7, 1 }
  0x14   : > { %312 = vrot.lane.b32.xlu0 %v308_v2, %s2154_s11  ;;  %652 = vrot.lane.b32.xlu1 %v2224_v1, %s2155_s12 }
  0x18   : > { %656 = vrot.lane.b32.xlu1 %v2222_v0, %s2155_s12  ;;  %654 = vrot.lane.b32.xlu0 %v308_v2, %s2155_s12 }
  0x1c   : > { %354 = vrot.lane.b32.xlu0 %v308_v2, %s2156_s13  ;;  %356 = vrot.lane.b32.xlu1 %v2222_v0, %s2156_s13 }
  0x20   : > { %352 = vrot.lane.b32.xlu0 %v2224_v1, %s2156_s13  ;;  %343 = vrot.lane.b32.xlu1 %v2224_v1, %s2158_s14 }
  0x24   : > { %345 = vrot.lane.b32.xlu0 %v308_v2, %s2158_s14  ;;  %347 = vrot.lane.b32.xlu1 %v2222_v0, %s2158_s14 }
  0x82   : > { %v315_v5 = vpop.permute.xlu1 %314  ;;  %v311_v6 = vpop.permute.xlu0 %310 }
  0x83   : > { %v2268_v14 = vsel %vm318_vm1, %v315_v5, %v311_v6 }
  0x86   : > { %v313_v8 = vpop.permute.xlu0 %312  ;;  %v653_v9 = vpop.permute.xlu1 %652 }
  0x87   : > { %v2256_v10 = vsel %vm318_vm1, %v311_v6, %v313_v8  ;;  %v2260_v11 = vsel %vm318_vm1, %v313_v8, %v315_v5 }
  0x88   : > { %334 = vrot.lane.b32.xlu0 %v2256_v10, %s2156_s13  ;;  %336 = vrot.lane.b32.xlu1 %v2260_v11, %s2156_s13 }
  0x8a   : > { %v657_v12 = vpop.permute.xlu1 %656  ;;  %v655_v13 = vpop.permute.xlu0 %654 }
  0x8b   : > { %v2284_v18 = vsel %vm658_vm3, %v655_v13, %v657_v12  ;;  %v2288_v21 = vsel %vm658_vm3, %v657_v12, %v653_v9  ;;  %v2301_v25 = vsel %vm658_vm3, %v653_v9, %v655_v13 }
  0x8c   : > { %332 = vrot.lane.b32.xlu0 %v2268_v14, %s2156_s13  ;;  %322 = vrot.lane.b32.xlu1 %v2268_v14, %s2158_s14 }
  0x8e   : > { %v355_v15 = vpop.permute.xlu0 %354  ;;  %v357_v16 = vpop.permute.xlu1 %356 }
  0x8f   : > { %v358_v17 = vsel %vm338_vm2, %v355_v15, %v357_v16 }
  0x90   : > { %324 = vrot.lane.b32.xlu0 %v2256_v10, %s2158_s14  ;;  %326 = vrot.lane.b32.xlu1 %v2260_v11, %s2158_s14 }
  0x91   : > { %393 = vmatprep.subr.mxu0 %v358_v17 }
  0x92   : > { %v353_v19 = vpop.permute.xlu0 %352  ;;  %v344_v20 = vpop.permute.xlu1 %343 }
  0x93   : > { %v359_v22 = vsel %vm338_vm2, %v353_v19, %v355_v15  ;;  %v360_v23 = vsel %vm338_vm2, %v357_v16, %v353_v19 }
  0x94   : > { %675 = vrot.lane.b32.xlu1 %v2288_v21, %s2156_s13  ;;  %673 = vrot.lane.b32.xlu0 %v2284_v18, %s2156_s13 }
  0x95   : > { %394 = vmatpush1.msra.mxu0 %v359_v22  ;;  %2048 = vmatpush3.msra.mxu1 %v360_v23 }
  0x96   : > { %395 = vmatprep.subr.mxu0 %v308_v2  ;;  %v346_v26 = vpop.permute.xlu0 %345  ;;  %v348_v27 = vpop.permute.xlu1 %347  ;;  %2049 = vmatprep.subr.mxu1 %v2157_v3  ;;  %v849_v2 = vshrl.u32 %v316_v4, 7 }
  0x97   : > { %396 = vmatpush1.msra.mxu0 %v2224_v1  ;;  %v350_v28 = vsel %vm328_vm4, %v344_v20, %v346_v26  ;;  %v351_v29 = vsel %vm328_vm4, %v348_v27, %v344_v20  ;;  %2050 = vmatpush3.msra.mxu1 %v2222_v0  ;;  %v349_v30 = vsel %vm328_vm4, %v346_v26, %v348_v27 }
  0x98   : > { %662 = vrot.lane.b32.xlu1 %v2301_v25, %s2158_s14  ;;  %671 = vrot.lane.b32.xlu0 %v2301_v25, %s2156_s13  ;;  %v850_v15 = vsub.s32 0, %v849_v2 }
  0x99   : > { %397 = vmatprep.subr.mxu0 %v350_v28  ;;  %2051 = vmatprep.subr.mxu1 %v2157_v3 }
  0x9a   : > { %398 = vmatpush1.msra.mxu0 %v351_v29  ;;  %2052 = vmatpush3.msra.mxu1 %v349_v30 }
  0x9b   : > { %2056 = vmatprep.subr.mxu1 %v2157_v3  ;;  %1986 = vmatmul.mubr.msk.f32.vlgmr.msra.gmra.mxu0 %vm363_vm5, %v1985_v31 }
  0x9c   : > { %666 = vrot.lane.b32.xlu1 %v2288_v21, %s2158_s14  ;;  %664 = vrot.lane.b32.xlu0 %v2284_v18, %s2158_s14 }
  0x9d   : > { %2054 = vmatmul.mubr.msk.f32.vlgmr.msra.gmra.mxu1 %vm363_vm5, %v1985_v31  ;;  %575 = vmatprep.mubr.f32.mxu0 %v2157_v3 }
  0x9e   : > { %2062 = vmatprep.mubr.msk.f32.mxu1 %vm2159_vm0, %v2157_v3 }
  0xa0   : > { %832 = vperm.xlu0 %2144, %v829_v32  }
  0xfa   : > { %v337_v33 = vpop.permute.xlu1 %336  ;;  %v335_v34 = vpop.permute.xlu0 %334 }
  0xfb   : > { %v339_v35 = vsel %vm338_vm2, %v335_v34, %v337_v33 }
  0xfc   : > { %537 = vmatprep.subr.mxu0 %v339_v35 }
  0xfe   : > { %v323_v36 = vpop.permute.xlu1 %322  ;;  %v333_v37 = vpop.permute.xlu0 %332 }
  0xff   : > { %v340_v38 = vsel %vm338_vm2, %v333_v37, %v335_v34  ;;  %v341_v39 = vsel %vm338_vm2, %v337_v33, %v333_v37 }
 0x100   : > { %538 = vmatpush1.msra.mxu0 %v340_v38  ;;  %2057 = vmatpush3.msra.mxu1 %v341_v39 }
 0x101   : > { %539 = vmatprep.subr.mxu0 %v2256_v10  ;;  %2058 = vmatprep.subr.mxu1 %v2157_v3  ;;  %v858_v10 = vsub.s32 2, %v849_v2 }
 0x102   : > { %v327_v40 = vpop.permute.xlu1 %326  ;;  %540 = vmatpush1.msra.mxu0 %v2268_v14  ;;  %2059 = vmatpush3.msra.mxu1 %v2260_v11  ;;  %v325_v41 = vpop.permute.xlu0 %324  ;;  %v306_v14 = vld [vmem:[%s2668_s7] sm:$0x7] }
 0x103   : > { %v331_v42 = vsel %vm328_vm4, %v327_v40, %v323_v36  ;;  %v329_v43 = vsel %vm328_vm4, %v325_v41, %v327_v40  ;;  %2060 = vmatprep.subr.mxu1 %v2157_v3  ;;  %v330_v44 = vsel %vm328_vm4, %v323_v36, %v325_v41  ;;  %v2389_v4 = vrot.slane %v306_v14, %v858_v10 }
 0x104   : > { %541 = vmatprep.subr.mxu0 %v330_v44  ;;  %2061 = vmatpush3.msra.mxu1 %v329_v43  ;;  %v2391_v24 = vrot.slane %v306_v14, %v850_v15 }
 0x105   : > { %542 = vmatpush1.msra.mxu0 %v331_v42  ;;  %2065 = vmatprep.subr.mxu1 %v2157_v3 }
 0x106   : > { %v676_v46 = vpop.permute.xlu1 %675  ;;  %1988 = vmatmul.mubr.msk.f32.vlgmr.msra.gmra.mxu0 %vm363_vm5, %v342_v45  ;;  %v674_v47 = vpop.permute.xlu0 %673  ;;  %2063 = vmatmul.mubr.msk.f32.vlgmr.msra.gmra.mxu1 %vm363_vm5, %v342_v45 }
 0x107   : > { %v677_v48 = vsel %vm338_vm2, %v674_v47, %v676_v46  ;;  %2071 = vmatprep.mubr.msk.f32.mxu1 %vm2159_vm0, %v2157_v3  ;;  %749 = vmatprep.mubr.f32.mxu0 %v2157_v3 }
 0x108   : > { %711 = vmatprep.subr.mxu0 %v677_v48 }
 0x10a   : > { %v663_v49 = vpop.permute.xlu1 %662  ;;  %v672_v50 = vpop.permute.xlu0 %671 }
 0x10b   : > { %v678_v51 = vsel %vm338_vm2, %v672_v50, %v674_v47  ;;  %v679_v52 = vsel %vm338_vm2, %v676_v46, %v672_v50 }
 0x10c   : > { %712 = vmatpush1.msra.mxu0 %v678_v51  ;;  %2066 = vmatpush3.msra.mxu1 %v679_v52 }
 0x10d   : > { %713 = vmatprep.subr.mxu0 %v2284_v18  ;;  %2067 = vmatprep.subr.mxu1 %v2157_v3 }
 0x10e   : > { %v667_v53 = vpop.permute.xlu1 %666  ;;  %714 = vmatpush1.msra.mxu0 %v2301_v25  ;;  %2068 = vmatpush3.msra.mxu1 %v2288_v21  ;;  %v665_v54 = vpop.permute.xlu0 %664  ;;  %v854_v21 = vsub.s32 1, %v849_v2 }
 0x10f   : > { %v670_v56 = vsel %vm328_vm4, %v667_v53, %v663_v49  ;;  %v668_v57 = vsel %vm328_vm4, %v665_v54, %v667_v53  ;;  %2069 = vmatprep.subr.mxu1 %v2157_v3  ;;  %v669_v58 = vsel %vm328_vm4, %v663_v49, %v665_v54 }
 0x110   : > { %715 = vmatprep.subr.mxu0 %v669_v58  ;;  %2070 = vmatpush3.msra.mxu1 %v668_v57  ;;  %v2393_v29 = vrot.slane %v306_v14, %v854_v21  ;;  %v1378_v58 = vld [vmem:[%s2665_s4] sm:$0xff] }
 0x111   : > { %716 = vmatpush1.msra.mxu0 %v670_v56  ;;  %2072 = vmatmul.mubr.msk.f32.vlgmr.msra.gmra.mxu1 %vm363_vm5, %v1990_v55 }
 0x112   : > { %1991 = vmatmul.mubr.msk.f32.vlgmr.msra.gmra.mxu0 %vm363_vm5, %v1990_v55  ;;  %2074 = vmatprep.subr.mxu1 %v2157_v3 }
 0x113   : > { %981 = vmatprep.mubr.f32.mxu0 %v2157_v3  ;;  %2080 = vmatprep.mubr.msk.f32.mxu1 %vm2159_vm0, %v2157_v3 }
 0x11b   : > { %v833_v11 = vpop.permute.xlu0 %832 }
 0x15b   : > { %v433_v61 = vpop.f32.mrf.mxu0 }
 0x15d   : > { %v504_v59 = vpop.f32.mrf.mxu1  ;;  %v435_v63 = vpop.f32.mrf.mxu0 }
 0x15f   : > { %v2055_v60 = vpop.f32.mrf.mxu1 }
 0x1c6   : > { %v648_v62 = vpop.f32.mrf.mxu1  ;;  %v577_v1 = vpop.f32.mrf.mxu0 }
 0x1c7   : > { %v649_v5 = vadd.f32 %v648_v62, %v504_v59  ;;  %v578_v8 = vadd.f32 %v577_v1, %v433_v61  ;;  %v1993_v61 = vld [vmem:[%s2664_s3 + $0x8] sm:$0xff] }
 0x1c8   : > { %v2064_v0 = vpop.f32.mrf.mxu1  ;;  %v579_v6 = vpop.f32.mrf.mxu0 }
 0x1c9   : > { %v580_v16 = vadd.f32 %v579_v6, %v435_v63 }
 0x1d1   : > { %v822_v9 = vpop.f32.mrf.mxu1 }
 0x1d2   : > { %v828_v12 = vadd.f32 %v822_v9, %v649_v5  ;;  %v751_v13 = vpop.f32.mrf.mxu0 }
 0x1d3   : > { %v826_v17 = vadd.f32 %v751_v13, %v578_v8  ;;  %v2073_v18 = vpop.f32.mrf.mxu1 }
 0x1d4   : > { %v837_v19 = vadd.f32 %v833_v11, %v828_v12  ;;  %v753_v20 = vpop.f32.mrf.mxu0 }
 0x1d5   : > { %v835_v22 = vadd.f32 %v833_v11, %v826_v17  ;;  %v827_v23 = vadd.f32 %v753_v20, %v580_v16  ;;  %v893_v16 = vld [vmem:[%s2664_s3] sm:$0xff] }
 0x1d6   : > { %vm840_vm6 = vcmp.ge.f32.partialorder %v837_v19, 0.0  ;;  %v843_v25 = vmul.f32 0.1, %v837_v19 }
 0x1d7   : > { %vm838_vm7 = vcmp.ge.f32.partialorder %v835_v22, 0.0  ;;  %v841_v26 = vmul.f32 0.1, %v835_v22  ;;  %v836_v27 = vadd.f32 %v833_v11, %v827_v23 }
 0x1d8   : > { %v846_v28 = vsel %vm840_vm6, %v837_v19, %v843_v25  ;;  %v1998_v25 = vld [vmem:[%s2664_s3 + $0x10] sm:$0xff] }
 0x1d9   : > { %v844_v30 = vsel %vm838_vm7, %v835_v22, %v841_v26  ;;  %v865_v31 = vmul.f32 %v2389_v4, %v846_v28  ;;  %vm839_vm8 = vcmp.ge.f32.partialorder %v836_v27, 0.0  ;;  %v842_v32 = vmul.f32 0.1, %v836_v27 }
 0x1da   : > { %v863_v33 = vmul.f32 %v2391_v24, %v844_v30 }
 0x1db   : > { %v845_v34 = vsel %vm839_vm8, %v836_v27, %v842_v32  ;;  %870 = vrot.lane.b32.xlu0 %v865_v31, %s2154_s11 }
 0x1dc   : > { %v864_v35 = vmul.f32 %v2393_v29, %v845_v34  ;;  %866 = vrot.lane.b32.xlu1 %v863_v33, %s2154_s11 }
 0x1df   : > { %1204 = vrot.lane.b32.xlu0 %v864_v35, %s2155_s12 }
 0x1e0   : > { %868 = vrot.lane.b32.xlu1 %v864_v35, %s2154_s11 }
 0x1e3   : > { %903 = vrot.lane.b32.xlu0 %v863_v33, %s2156_s13 }
 0x1e4   : > { %1202 = vrot.lane.b32.xlu1 %v863_v33, %s2155_s12 }
 0x1e7   : > { %905 = vrot.lane.b32.xlu0 %v864_v35, %s2156_s13 }
 0x1e8   : > { %1206 = vrot.lane.b32.xlu1 %v865_v31, %s2155_s12 }
 0x1eb   : > { %896 = vrot.lane.b32.xlu0 %v864_v35, %s2158_s14 }
 0x1ec   : > { %907 = vrot.lane.b32.xlu1 %v865_v31, %s2156_s13 }
 0x1f0   : > { %894 = vrot.lane.b32.xlu1 %v863_v33, %s2158_s14 }
 0x1f4   : > { %898 = vrot.lane.b32.xlu1 %v865_v31, %s2158_s14 }
 0x24d   : > { %v871_v36 = vpop.permute.xlu0 %870 }
 0x24e   : > { %v867_v37 = vpop.permute.xlu1 %866 }
 0x24f   : > { %v2412_v38 = vsel %vm318_vm1, %v871_v36, %v867_v37 }
 0x250   : > { %875 = vrot.lane.b32.xlu1 %v2412_v38, %s2158_s14  ;;  %884 = vrot.lane.b32.xlu0 %v2412_v38, %s2156_s13 }
 0x251   : > { %v1205_v39 = vpop.permute.xlu0 %1204 }
 0x252   : > { %v869_v40 = vpop.permute.xlu1 %868 }
 0x253   : > { %v873_v41 = vsel %vm318_vm1, %v867_v37, %v869_v40  ;;  %v872_v50 = vsel %vm318_vm1, %v869_v40, %v871_v36 }
 0x254   : > { %886 = vrot.lane.b32.xlu0 %v873_v41, %s2156_s13 }
 0x255   : > { %v904_v42 = vpop.permute.xlu0 %903 }
 0x256   : > { %v1203_v43 = vpop.permute.xlu1 %1202 }
 0x257   : > { %v2440_v51 = vsel %vm658_vm3, %v1203_v43, %v1205_v39 }
 0x258   : > { %877 = vrot.lane.b32.xlu0 %v873_v41, %s2158_s14 }
 0x259   : > { %v906_v47 = vpop.permute.xlu0 %905 }
 0x25a   : > { %v1207_v44 = vpop.permute.xlu1 %1206  ;;  %v910_v53 = vsel %vm338_vm2, %v904_v42, %v906_v47 }
 0x25b   : > { %v2424_v45 = vsel %vm658_vm3, %v1207_v44, %v1203_v43  ;;  %v2428_v46 = vsel %vm658_vm3, %v1205_v39, %v1207_v44 }
 0x25c   : > { %1224 = vrot.lane.b32.xlu1 %v2424_v45, %s2156_s13  ;;  %1222 = vrot.lane.b32.xlu0 %v2428_v46, %s2156_s13 }
 0x25d   : > { %v897_v54 = vpop.permute.xlu0 %896 }
 0x25e   : > { %v908_v48 = vpop.permute.xlu1 %907 }
 0x25f   : > { %v911_v49 = vsel %vm338_vm2, %v908_v48, %v904_v42  ;;  %v909_v52 = vsel %vm338_vm2, %v906_v47, %v908_v48 }
 0x260   : > { %888 = vrot.lane.b32.xlu1 %v872_v50, %s2156_s13  ;;  %1220 = vrot.lane.b32.xlu0 %v2440_v51, %s2156_s13 }
 0x261   : > { %943 = vmatprep.subr.mxu0 %v909_v52  ;;  %2075 = vmatpush3.msra.mxu1 %v911_v49 }
 0x262   : > { %944 = vmatpush1.msra.mxu0 %v910_v53  ;;  %2076 = vmatprep.subr.mxu1 %v2157_v3  ;;  %v895_v55 = vpop.permute.xlu1 %894 }
 0x263   : > { %945 = vmatprep.subr.mxu0 %v864_v35  ;;  %2077 = vmatpush3.msra.mxu1 %v865_v31  ;;  %v901_v56 = vsel %vm328_vm4, %v895_v55, %v897_v54 }
 0x264   : > { %946 = vmatpush1.msra.mxu0 %v863_v33  ;;  %879 = vrot.lane.b32.xlu1 %v872_v50, %s2158_s14 }
 0x265   : > { %1213 = vrot.lane.b32.xlu0 %v2428_v46, %s2158_s14  ;;  %947 = vmatprep.subr.mxu0 %v901_v56 }
 0x266   : > { %v899_v57 = vpop.permute.xlu1 %898  ;;  %2078 = vmatprep.subr.mxu1 %v2157_v3 }
 0x267   : > { %v900_v59 = vsel %vm328_vm4, %v897_v54, %v899_v57  ;;  %v902_v60 = vsel %vm328_vm4, %v899_v57, %v895_v55 }
 0x268   : > { %1211 = vrot.lane.b32.xlu1 %v2440_v51, %s2158_s14  ;;  %948 = vmatpush1.msra.mxu0 %v902_v60 }
 0x269   : > { %1381 = vperm.xlu0 %2144, %v1378_v58   ;;  %2079 = vmatpush3.msra.mxu1 %v900_v59 }
 0x26a   : > { %2083 = vmatprep.subr.mxu1 %v2157_v3  ;;  %1994 = vmatmul.mubr.msk.f32.vlgmr.msra.gmra.mxu0 %vm363_vm5, %v1993_v61 }
 0x26b   : > { %2081 = vmatmul.mubr.msk.f32.vlgmr.msra.gmra.mxu1 %vm363_vm5, %v1993_v61  ;;  %1125 = vmatprep.mubr.f32.mxu0 %v2157_v3 }
 0x26c   : > { %1215 = vrot.lane.b32.xlu1 %v2424_v45, %s2158_s14  ;;  %2089 = vmatprep.mubr.msk.f32.mxu1 %vm2159_vm0, %v2157_v3 }
 0x2c2   : > { %v885_v62 = vpop.permute.xlu0 %884  ;;  %v876_v0 = vpop.permute.xlu1 %875 }
 0x2c6   : > { %v887_v63 = vpop.permute.xlu0 %886 }
 0x2c7   : > { %v891_v10 = vsel %vm338_vm2, %v885_v62, %v887_v63 }
 0x2ca   : > { %v878_v1 = vpop.permute.xlu0 %877 }
 0x2cb   : > { %v882_v15 = vsel %vm328_vm4, %v876_v0, %v878_v1 }
 0x2ce   : > { %v1225_v2 = vpop.permute.xlu1 %1224  ;;  %v1223_v5 = vpop.permute.xlu0 %1222 }
 0x2cf   : > { %v1226_v18 = vsel %vm338_vm2, %v1223_v5, %v1225_v2 }
 0x2d2   : > { %v889_v6 = vpop.permute.xlu1 %888  ;;  %v1221_v12 = vpop.permute.xlu0 %1220 }
 0x2d3   : > { %v892_v8 = vsel %vm338_vm2, %v889_v6, %v885_v62  ;;  %v890_v9 = vsel %vm338_vm2, %v887_v63, %v889_v6  ;;  %v1228_v17 = vsel %vm338_vm2, %v1225_v2, %v1221_v12  ;;  %v1227_v20 = vsel %vm338_vm2, %v1221_v12, %v1223_v5 }
 0x2d4   : > { %1087 = vmatprep.subr.mxu0 %v890_v9  ;;  %2084 = vmatpush3.msra.mxu1 %v892_v8 }
 0x2d5   : > { %1088 = vmatpush1.msra.mxu0 %v891_v10  ;;  %2085 = vmatprep.subr.mxu1 %v2157_v3 }
 0x2d6   : > { %1089 = vmatprep.subr.mxu0 %v873_v41  ;;  %2086 = vmatpush3.msra.mxu1 %v872_v50  ;;  %v880_v11 = vpop.permute.xlu1 %879 }
 0x2d7   : > { %v881_v13 = vsel %vm328_vm4, %v878_v1, %v880_v11  ;;  %v883_v14 = vsel %vm328_vm4, %v880_v11, %v876_v0  ;;  %1090 = vmatpush1.msra.mxu0 %v2412_v38  ;;  %2087 = vmatprep.subr.mxu1 %v2157_v3  ;;  %v1214_v21 = vpop.permute.xlu0 %1213 }
 0x2d8   : > { %1091 = vmatprep.subr.mxu0 %v882_v15  ;;  %2088 = vmatpush3.msra.mxu1 %v881_v13 }
 0x2d9   : > { %1092 = vmatpush1.msra.mxu0 %v883_v14  ;;  %2092 = vmatprep.subr.mxu1 %v2157_v3 }
 0x2da   : > { %1996 = vmatmul.mubr.msk.f32.vlgmr.msra.gmra.mxu0 %vm363_vm5, %v893_v16  ;;  %2090 = vmatmul.mubr.msk.f32.vlgmr.msra.gmra.mxu1 %vm363_vm5, %v893_v16  ;;  %v1212_v19 = vpop.permute.xlu1 %1211 }
 0x2db   : > { %1260 = vmatprep.subr.mxu0 %v1226_v18  ;;  %2093 = vmatpush3.msra.mxu1 %v1228_v17  ;;  %v1218_v22 = vsel %vm328_vm4, %v1212_v19, %v1214_v21  ;;  %v2001_v18 = vld [vmem:[%s2666_s5 + $0x8] sm:$0xff] }
 0x2dc   : > { %1261 = vmatpush1.msra.mxu0 %v1227_v20  ;;  %2094 = vmatprep.subr.mxu1 %v2157_v3 }
 0x2dd   : > { %1262 = vmatprep.subr.mxu0 %v2428_v46  ;;  %2095 = vmatpush3.msra.mxu1 %v2424_v45 }
 0x2de   : > { %1263 = vmatpush1.msra.mxu0 %v2440_v51  ;;  %v1216_v23 = vpop.permute.xlu1 %1215  ;;  %2096 = vmatprep.subr.mxu1 %v2157_v3 }
 0x2df   : > { %1264 = vmatprep.subr.mxu0 %v1218_v22  ;;  %v1217_v26 = vsel %vm328_vm4, %v1214_v21, %v1216_v23  ;;  %v1219_v27 = vsel %vm328_vm4, %v1216_v23, %v1212_v19  ;;  %1298 = vmatprep.mubr.f32.mxu0 %v2157_v3  ;;  %v1911_v21 = vld [vmem:[%s2667_s6] sm:$0xff] }
 0x2e0   : > { %1265 = vmatpush1.msra.mxu0 %v1219_v27  ;;  %2097 = vmatpush3.msra.mxu1 %v1217_v26 }
 0x2e1   : > { %2098 = vmatprep.mubr.msk.f32.mxu1 %vm2159_vm0, %v2157_v3  ;;  %1999 = vmatmul.mubr.msk.f32.vlgmr.msra.gmra.mxu0 %vm363_vm5, %v1998_v25 }
 0x2e2   : > { %2099 = vmatmul.mubr.msk.f32.vlgmr.msra.gmra.mxu1 %vm363_vm5, %v1998_v25  ;;  %2101 = vmatprep.subr.mxu1 %v2157_v3 }
 0x2e3   : > { %1514 = vmatprep.mubr.f32.mxu0 %v2157_v3  ;;  %2107 = vmatprep.mubr.msk.f32.mxu1 %vm2159_vm0, %v2157_v3 }
 0x2e4   : > { %v1382_v43 = vpop.permute.xlu0 %1381 }
 0x32a   : > { %v983_v31 = vpop.f32.mrf.mxu0 }
 0x32b   : > { %v1054_v28 = vpop.f32.mrf.mxu1 }
 0x32c   : > { %v985_v32 = vpop.f32.mrf.mxu0 }
 0x32d   : > { %v2082_v30 = vpop.f32.mrf.mxu1 }
 0x39a   : > { %v1198_v33 = vpop.f32.mrf.mxu1  ;;  %v1127_v34 = vpop.f32.mrf.mxu0 }
 0x39b   : > { %v1128_v37 = vadd.f32 %v1127_v34, %v983_v31  ;;  %v1199_v38 = vadd.f32 %v1198_v33, %v1054_v28 }
 0x39c   : > { %v2091_v35 = vpop.f32.mrf.mxu1  ;;  %v1129_v36 = vpop.f32.mrf.mxu0 }
 0x39d   : > { %v1130_v40 = vadd.f32 %v1129_v36, %v985_v32  ;;  %v1426_v35 = vld [vmem:[%s2666_s5] sm:$0xff] }
 0x3a1   : > { %v1300_v39 = vpop.f32.mrf.mxu0 }
 0x3a2   : > { %v1375_v41 = vadd.f32 %v1300_v39, %v1128_v37  ;;  %v1371_v42 = vpop.f32.mrf.mxu1 }
 0x3a3   : > { %v1377_v44 = vadd.f32 %v1371_v42, %v1199_v38  ;;  %v1302_v45 = vpop.f32.mrf.mxu0 }
 0x3a4   : > { %v1384_v46 = vadd.f32 %v1382_v43, %v1375_v41  ;;  %v1376_v47 = vadd.f32 %v1302_v45, %v1130_v40  ;;  %v2100_v48 = vpop.f32.mrf.mxu1 }
 0x3a5   : > { %v1386_v49 = vadd.f32 %v1382_v43, %v1377_v44 }
 0x3a6   : > { %vm1387_vm9 = vcmp.ge.f32.partialorder %v1384_v46, 0.0  ;;  %v1390_v50 = vmul.f32 0.1, %v1384_v46  ;;  %v1385_v51 = vadd.f32 %v1382_v43, %v1376_v47  ;;  %v2006_v47 = vld [vmem:[%s2666_s5 + $0x10] sm:$0xff] }
 0x3a7   : > { %vm1389_vm10 = vcmp.ge.f32.partialorder %v1386_v49, 0.0  ;;  %v1392_v52 = vmul.f32 0.1, %v1386_v49 }
 0x3a8   : > { %v1393_v53 = vsel %vm1387_vm9, %v1384_v46, %v1390_v50  ;;  %vm1388_vm11 = vcmp.ge.f32.partialorder %v1385_v51, 0.0  ;;  %v1391_v54 = vmul.f32 0.1, %v1385_v51 }
 0x3a9   : > { %v1396_v55 = vmul.f32 %v1393_v53, %v2391_v24  ;;  %v1395_v56 = vsel %vm1389_vm10, %v1386_v49, %v1392_v52 }
 0x3aa   : > { %v1394_v57 = vsel %vm1388_vm11, %v1385_v51, %v1391_v54  ;;  %v1398_v59 = vmul.f32 %v1395_v56, %v2389_v4 }
 0x3ab   : > { %v1397_v58 = vmul.f32 %v1394_v57, %v2393_v29  ;;  %1399 = vrot.lane.b32.xlu1 %v1396_v55, %s2154_s11 }
 0x3ad   : > { %1401 = vrot.lane.b32.xlu0 %v1397_v58, %s2154_s11 }
 0x3af   : > { %1403 = vrot.lane.b32.xlu1 %v1398_v59, %s2154_s11 }
 0x3b1   : > { %1735 = vrot.lane.b32.xlu0 %v1396_v55, %s2155_s12 }
 0x3b3   : > { %1737 = vrot.lane.b32.xlu1 %v1397_v58, %s2155_s12 }
 0x3b5   : > { %1739 = vrot.lane.b32.xlu0 %v1398_v59, %s2155_s12 }
 0x3b7   : > { %1436 = vrot.lane.b32.xlu1 %v1396_v55, %s2156_s13 }
 0x3b9   : > { %1440 = vrot.lane.b32.xlu0 %v1398_v59, %s2156_s13 }
 0x3bb   : > { %1438 = vrot.lane.b32.xlu1 %v1397_v58, %s2156_s13 }
 0x3bd   : > { %1427 = vrot.lane.b32.xlu0 %v1396_v55, %s2158_s14 }
 0x3bf   : > { %1429 = vrot.lane.b32.xlu1 %v1397_v58, %s2158_s14 }
 0x3c1   : > { %1431 = vrot.lane.b32.xlu0 %v1398_v59, %s2158_s14 }
 0x41d   : > { %v1400_v4 = vpop.permute.xlu1 %1399 }
 0x41f   : > { %v1402_v24 = vpop.permute.xlu0 %1401 }
 0x420   : > { %v1406_v63 = vsel %vm318_vm1, %v1400_v4, %v1402_v24 }
 0x421   : > { %v1404_v29 = vpop.permute.xlu1 %1403 }
 0x422   : > { %v2543_v60 = vsel %vm318_vm1, %v1404_v29, %v1400_v4  ;;  %v1405_v8 = vsel %vm318_vm1, %v1402_v24, %v1404_v29 }
 0x423   : > { %v1736_v61 = vpop.permute.xlu0 %1735  ;;  %1408 = vrot.lane.b32.xlu0 %v2543_v60, %s2158_s14  ;;  %1417 = vrot.lane.b32.xlu1 %v2543_v60, %s2156_s13 }
 0x425   : > { %v1738_v62 = vpop.permute.xlu1 %1737 }
 0x426   : > { %v2578_v15 = vsel %vm658_vm3, %v1736_v61, %v1738_v62 }
 0x427   : > { %v1740_v0 = vpop.permute.xlu0 %1739  ;;  %1419 = vrot.lane.b32.xlu1 %v1406_v63, %s2156_s13 }
 0x428   : > { %v2554_v1 = vsel %vm658_vm3, %v1740_v0, %v1736_v61  ;;  %v2569_v11 = vsel %vm658_vm3, %v1738_v62, %v1740_v0 }
 0x429   : > { %1757 = vrot.lane.b32.xlu0 %v2554_v1, %s2156_s13  ;;  %v1437_v2 = vpop.permute.xlu1 %1436 }
 0x42b   : > { %v1441_v5 = vpop.permute.xlu0 %1440  ;;  %1410 = vrot.lane.b32.xlu1 %v1406_v63, %s2158_s14 }
 0x42c   : > { %v1444_v6 = vsel %vm338_vm2, %v1441_v5, %v1437_v2 }
 0x42d   : > { %1421 = vrot.lane.b32.xlu0 %v1405_v8, %s2156_s13  ;;  %2102 = vmatpush3.msra.mxu1 %v1444_v6  ;;  %v1439_v9 = vpop.permute.xlu1 %1438 }
 0x42e   : > { %v1443_v10 = vsel %vm338_vm2, %v1437_v2, %v1439_v9  ;;  %2103 = vmatprep.subr.mxu1 %v2157_v3  ;;  %v1442_v12 = vsel %vm338_vm2, %v1439_v9, %v1441_v5 }
 0x42f   : > { %v1428_v13 = vpop.permute.xlu0 %1427  ;;  %1755 = vrot.lane.b32.xlu1 %v2569_v11, %s2156_s13  ;;  %1476 = vmatprep.subr.mxu0 %v1442_v12 }
 0x430   : > { %2104 = vmatpush3.msra.mxu1 %v1398_v59  ;;  %1477 = vmatpush1.msra.mxu0 %v1443_v10 }
 0x431   : > { %1412 = vrot.lane.b32.xlu0 %v1405_v8, %s2158_s14  ;;  %1478 = vmatprep.subr.mxu0 %v1397_v58  ;;  %v1430_v14 = vpop.permute.xlu1 %1429 }
 0x432   : > { %1479 = vmatpush1.msra.mxu0 %v1396_v55  ;;  %v1434_v16 = vsel %vm328_vm4, %v1428_v13, %v1430_v14  ;;  %2105 = vmatprep.subr.mxu1 %v2157_v3 }
 0x433   : > { %v1432_v17 = vpop.permute.xlu0 %1431  ;;  %1753 = vrot.lane.b32.xlu1 %v2578_v15, %s2156_s13  ;;  %1480 = vmatprep.subr.mxu0 %v1434_v16 }
 0x434   : > { %v1433_v19 = vsel %vm328_vm4, %v1430_v14, %v1432_v17  ;;  %v1435_v20 = vsel %vm328_vm4, %v1432_v17, %v1428_v13 }
 0x435   : > { %1744 = vrot.lane.b32.xlu0 %v2578_v15, %s2158_s14  ;;  %1481 = vmatpush1.msra.mxu0 %v1435_v20 }
 0x436   : > { %2106 = vmatpush3.msra.mxu1 %v1433_v19  ;;  %2002 = vmatmul.mubr.msk.f32.vlgmr.msra.gmra.mxu0 %vm363_vm5, %v2001_v18 }
 0x437   : > { %1746 = vrot.lane.b32.xlu1 %v2569_v11, %s2158_s14  ;;  %2110 = vmatprep.subr.mxu1 %v2157_v3 }
 0x438   : > { %2108 = vmatmul.mubr.msk.f32.vlgmr.msra.gmra.mxu1 %vm363_vm5, %v2001_v18  ;;  %1658 = vmatprep.mubr.f32.mxu0 %v2157_v3 }
 0x439   : > { %1748 = vrot.lane.b32.xlu0 %v2554_v1, %s2158_s14  ;;  %2116 = vmatprep.mubr.msk.f32.mxu1 %vm2159_vm0, %v2157_v3 }
 0x43b   : > { %1914 = vperm.xlu1 %2145, %v1911_v21  }
 0x495   : > { %v1418_v22 = vpop.permute.xlu1 %1417  ;;  %v1409_v23 = vpop.permute.xlu0 %1408 }
 0x499   : > { %v1420_v25 = vpop.permute.xlu1 %1419 }
 0x49a   : > { %v1424_v32 = vsel %vm338_vm2, %v1418_v22, %v1420_v25 }
 0x49b   : > { %v1758_v26 = vpop.permute.xlu0 %1757 }
 0x49d   : > { %v1411_v27 = vpop.permute.xlu1 %1410 }
 0x49e   : > { %v1415_v38 = vsel %vm328_vm4, %v1409_v23, %v1411_v27 }
 0x49f   : > { %v1422_v28 = vpop.permute.xlu0 %1421 }
 0x4a0   : > { %v1425_v30 = vsel %vm338_vm2, %v1422_v28, %v1418_v22  ;;  %v1423_v31 = vsel %vm338_vm2, %v1420_v25, %v1422_v28 }
 0x4a1   : > { %1620 = vmatprep.subr.mxu0 %v1423_v31  ;;  %2111 = vmatpush3.msra.mxu1 %v1425_v30  ;;  %v1756_v33 = vpop.permute.xlu1 %1755 }
 0x4a2   : > { %1621 = vmatpush1.msra.mxu0 %v1424_v32  ;;  %2112 = vmatprep.subr.mxu1 %v2157_v3  ;;  %v1759_v43 = vsel %vm338_vm2, %v1756_v33, %v1758_v26 }
 0x4a3   : > { %v1413_v34 = vpop.permute.xlu0 %1412  ;;  %1622 = vmatprep.subr.mxu0 %v1406_v63  ;;  %2113 = vmatpush3.msra.mxu1 %v1405_v8 }
 0x4a4   : > { %v1414_v36 = vsel %vm328_vm4, %v1411_v27, %v1413_v34  ;;  %v1416_v37 = vsel %vm328_vm4, %v1413_v34, %v1409_v23  ;;  %1623 = vmatpush1.msra.mxu0 %v2543_v60  ;;  %2114 = vmatprep.subr.mxu1 %v2157_v3 }
 0x4a5   : > { %1624 = vmatprep.subr.mxu0 %v1415_v38  ;;  %2115 = vmatpush3.msra.mxu1 %v1414_v36  ;;  %v1754_v39 = vpop.permute.xlu1 %1753 }
 0x4a6   : > { %v1760_v40 = vsel %vm338_vm2, %v1754_v39, %v1756_v33  ;;  %v1761_v41 = vsel %vm338_vm2, %v1758_v26, %v1754_v39  ;;  %1625 = vmatpush1.msra.mxu0 %v1416_v37  ;;  %2117 = vmatmul.mubr.msk.f32.vlgmr.msra.gmra.mxu1 %vm363_vm5, %v1426_v35 }
 0x4a7   : > { %2119 = vmatprep.subr.mxu1 %v2157_v3  ;;  %v1745_v42 = vpop.permute.xlu0 %1744  ;;  %2004 = vmatmul.mubr.msk.f32.vlgmr.msra.gmra.mxu0 %vm363_vm5, %v1426_v35 }
 0x4a8   : > { %1793 = vmatprep.subr.mxu0 %v1759_v43  ;;  %2120 = vmatpush3.msra.mxu1 %v1761_v41 }
 0x4a9   : > { %1794 = vmatpush1.msra.mxu0 %v1760_v40  ;;  %2121 = vmatprep.subr.mxu1 %v2157_v3  ;;  %v1747_v44 = vpop.permute.xlu1 %1746 }
 0x4aa   : > { %1795 = vmatprep.subr.mxu0 %v2569_v11  ;;  %2122 = vmatpush3.msra.mxu1 %v2554_v1  ;;  %v1751_v45 = vsel %vm328_vm4, %v1745_v42, %v1747_v44 }
 0x4ab   : > { %1796 = vmatpush1.msra.mxu0 %v2578_v15  ;;  %v1749_v46 = vpop.permute.xlu0 %1748  ;;  %2123 = vmatprep.subr.mxu1 %v2157_v3 }
 0x4ac   : > { %v1750_v48 = vsel %vm328_vm4, %v1747_v44, %v1749_v46  ;;  %v1752_v49 = vsel %vm328_vm4, %v1749_v46, %v1745_v42  ;;  %1797 = vmatprep.subr.mxu0 %v1751_v45  ;;  %1831 = vmatprep.mubr.f32.mxu0 %v2157_v3 }
 0x4ad   : > { %1798 = vmatpush1.msra.mxu0 %v1752_v49  ;;  %2124 = vmatpush3.msra.mxu1 %v1750_v48 }
 0x4ae   : > { %2125 = vmatprep.mubr.msk.f32.mxu1 %vm2159_vm0, %v2157_v3  ;;  %2007 = vmatmul.mubr.msk.f32.vlgmr.msra.gmra.mxu0 %vm363_vm5, %v2006_v47 }
 0x4af   : > { %2126 = vmatmul.mubr.msk.f32.vlgmr.msra.gmra.mxu1 %vm363_vm5, %v2006_v47 }
 0x4b6   : > { %v1915_v4 = vpop.permute.xlu1 %1914 }
 0x4f6   : > { %v1516_v52 = vpop.f32.mrf.mxu0 }
 0x4f8   : > { %v1587_v50 = vpop.f32.mrf.mxu1  ;;  %v1518_v53 = vpop.f32.mrf.mxu0 }
 0x4fa   : > { %v2109_v51 = vpop.f32.mrf.mxu1 }
 0x566   : > { %v1731_v54 = vpop.f32.mrf.mxu1 }
 0x567   : > { %v1660_v7 = vpop.f32.mrf.mxu0  ;;  %v1732_v58 = vadd.f32 %v1731_v54, %v1587_v50 }
 0x568   : > { %v2118_v55 = vpop.f32.mrf.mxu1  ;;  %v1661_v57 = vadd.f32 %v1660_v7, %v1516_v52 }
 0x569   : > { %v1662_v56 = vpop.f32.mrf.mxu0 }
 0x56a   : > { %v1663_v24 = vadd.f32 %v1662_v56, %v1518_v53 }
 0x56e   : > { %v1833_v59 = vpop.f32.mrf.mxu0 }
 0x56f   : > { %v1908_v29 = vadd.f32 %v1833_v59, %v1661_v57  ;;  %v1904_v3 = vpop.f32.mrf.mxu1 }
 0x570   : > { %v1910_v60 = vadd.f32 %v1904_v3, %v1732_v58  ;;  %v1835_v61 = vpop.f32.mrf.mxu0 }
 0x571   : > { %v1909_v62 = vadd.f32 %v1835_v61, %v1663_v24  ;;  %v1917_v63 = vadd.f32 %v1915_v4, %v1908_v29  ;;  %v2127_v0 = vpop.f32.mrf.mxu1 }
 0x572   : > { %v1919_v1 = vadd.f32 %v1915_v4, %v1910_v60 }
 0x573   : > { %v1918_v2 = vadd.f32 %v1915_v4, %v1909_v62  ;;  %1920 = vst [vmem:[%s305_s24] sm:$0xff] %v1917_v63 }
 0x574   : > { %1922 = vst [vmem:[%s305_s24 + $0x10] sm:$0xff] %v1919_v1 }
 0x575   : > { %1921 = vst [vmem:[%s305_s24 + $0x8] sm:$0xff] %v1918_v2 }
 0x576 PF: > { %s18_s27 = sadd.s32 1, %s2152_s27  }
 0x577   : > { %p15_p4 = scmp.ge.s32.totalorder %s18_s27, 4  }
 0x579   :  { %17 = sbr.rel (!%p15_p4) target bundleno = 1 (0x1), region = 88 }

</bundles_post_ra>
